<compile_context>
chip_gen: v6e
topology: v6e:2x2x1
jax: 0.10.0
libtpu: 0.0.40
codegen_flags: <defaults>
</compile_context>

<pallas_src>
import math

import jax
import jax.numpy as jnp
from jax.experimental import pallas as pl
from jax.experimental.pallas import tpu as pltpu

_LANE = 128
_SUBLANE = 8


def _round_up(v, m):
    return (v + m - 1) // m * m


def _cdiv(a, b):
    return -(-a // b)


def _act_fn(activation):
    if activation == "relu":
        return lambda v: jnp.maximum(v, 0.0)
    if activation == "tanh":
        # TODO(synk): on v6e/v7x tanh could run in bf16 on the EUP for ~2x
        # transcendental throughput; kept f32 for v5e compatibility/accuracy.
        return jnp.tanh
    raise ValueError(f"Unsupported activation: {activation}. Choose from ['relu', 'tanh']")


def _vmem_capacity_bytes():
    try:
        return int(pltpu.get_tpu_info().vmem_capacity_bytes)
    except Exception:
        return 64 * 1024 * 1024  # conservative (v7x-sized) fallback


# --------------------------------------------------------------------------
# Parameter init / one-time preparation
# --------------------------------------------------------------------------
def init_discrim_params(key, x_dim, hidden_dim, num_labels, layers):
    """PyTorch-Linear-style uniform init. Returns [(w (in,out) f32, b (out,) f32), ...]."""
    dims = [x_dim] + [hidden_dim] * (layers + 1) + [num_labels]
    params = []
    for li in range(len(dims) - 1):
        key, kw, kb = jax.random.split(key, 3)
        fan_in, fan_out = dims[li], dims[li + 1]
        bound = 1.0 / math.sqrt(fan_in)
        w = jax.random.uniform(kw, (fan_in, fan_out), jnp.float32, -bound, bound)
        b = jax.random.uniform(kb, (fan_out,), jnp.float32, -bound, bound)
        params.append((w, b))
    return params


def prepare_discrim_params(params, piece_dims):
    """One-time pad (feature dims -> 128 lanes) + bf16 cast of the weights.

    Layer-0's weight is split into per-piece row slices so the torch
    `cat(xs, -1)` can be fused into the kernel as partial matmuls.
    """
    piece_dims = tuple(int(d) for d in piece_dims)
    x_dim = sum(piece_dims)
    w0, b0 = params[0]
    assert w0.shape[0] == x_dim, "piece_dims must sum to the first Linear's in_features"

    dims = [x_dim] + [w.shape[1] for (w, _) in params]     # unpadded layer widths

    ph0 = _round_up(w0.shape[1], _LANE)
    w0_pieces = []
    off = 0
    for d in piece_dims:
        wp = jnp.zeros((d, ph0), jnp.bfloat16)
        wp = wp.at[:, : w0.shape[1]].set(w0[off: off + d].astype(jnp.bfloat16))
        w0_pieces.append(wp)
        off += d
    b0p = jnp.zeros((1, ph0), jnp.float32).at[0, : b0.shape[0]].set(b0)

    rest = []
    pad_prev = ph0
    for (w, b) in params[1:]:
        fi, fo = w.shape
        po = _round_up(fo, _LANE)
        wp = jnp.zeros((pad_prev, po), jnp.bfloat16).at[:fi, :fo].set(w.astype(jnp.bfloat16))
        bp = jnp.zeros((1, po), jnp.float32).at[0, :fo].set(b)
        rest.append((wp, bp))
        pad_prev = po

    return dict(
        piece_dims=piece_dims,
        dims=dims,
        num_labels=dims[-1],
        pad_hidden=ph0,
        pad_out=pad_prev,
        w0_pieces=w0_pieces,
        b0=b0p,
        rest=rest,
    )


# --------------------------------------------------------------------------
# Kernel
# --------------------------------------------------------------------------
def _make_discrim_kernel(n_pieces, n_linear, activation):
    act = _act_fn(activation)

    def kernel(*refs):
        o_ref = refs[-1]
        x_refs = refs[:n_pieces]
        w0_refs = refs[n_pieces: 2 * n_pieces]
        b0_ref = refs[2 * n_pieces]
        wb = refs[2 * n_pieces + 1: -1]            # (w1, b1, w2, b2, ...)

        # ---- layer 0: fused `cat(xs, -1)` as per-piece partial matmuls ----
        acc = jnp.dot(x_refs[0][...].astype(jnp.bfloat16), w0_refs[0][...],
                      preferred_element_type=jnp.float32)
        for p in range(1, n_pieces):
            acc = acc + jnp.dot(x_refs[p][...].astype(jnp.bfloat16), w0_refs[p][...],
                                preferred_element_type=jnp.float32)
        acc = acc + b0_ref[...]                     # f32 bias, broadcast over rows

        # ---- remaining Linear layers ----
        for li in range(1, n_linear):
            h = act(acc).astype(jnp.bfloat16)       # activation in f32, MXU operand bf16
            w_ref, b_ref = wb[2 * (li - 1)], wb[2 * (li - 1) + 1]
            acc = jnp.dot(h, w_ref[...], preferred_element_type=jnp.float32) + b_ref[...]

        o_ref[...] = acc.astype(o_ref.dtype)        # bf16 store, lane-dense (pad_out)

    return kernel


# --------------------------------------------------------------------------
# Forward
# --------------------------------------------------------------------------
def discrim_forward(xs, prep, activation="relu"):
    """xs: sequence of (B, d_i) float32 arrays. Returns f32 logits (B, num_labels)."""
    piece_dims = tuple(int(x.shape[-1]) for x in xs)
    assert piece_dims == prep["piece_dims"], "xs feature dims must match prepared params"
    B = int(xs[0].shape[0])

    w0_pieces, b0, rest = prep["w0_pieces"], prep["b0"], prep["rest"]
    pad_hidden, pad_out = prep["pad_hidden"], prep["pad_out"]
    num_labels, dims = prep["num_labels"], prep["dims"]
    n_pieces = len(piece_dims)
    n_linear = len(rest) + 1
    act = _act_fn(activation)  # validates activation early (matches torch ValueError)

    # ---- chip-aware VMEM budgeting ----
    vmem_cap = _vmem_capacity_bytes()                       # 64 MiB (v7x) .. 128 MiB (v5e/v6e)
    budget = int(vmem_cap * 0.70)
    tb_cap = 1024 if vmem_cap >= 96 * 1024 * 1024 else 512

    weight_bytes = (sum(w.size * 2 for w in w0_pieces) + b0.size * 4
                    + sum(w.size * 2 + b.size * 4 for w, b in rest))
    sum_di = sum(piece_dims)
    # per-row streamed bytes (double-buffered f32 inputs + bf16 output) plus a
    # rough allowance for the f32/bf16 intermediates the compiler keeps live.
    per_row = 2 * sum_di * 4 + 2 * pad_out * 2 + 12 * pad_hidden

    # Conservative: budget as if weights were double-buffered even though we
    # request single-buffering below (keeps the Buffered(1) fallback safe).
    avail = budget - 2 * weight_bytes
    if avail < _SUBLANE * per_row:
        # TODO(synk): implement a K/N-tiled multi-pass Pallas kernel for very
        # large hidden_dim/layers; fall back to plain XLA matmuls for now.
        acc = jnp.dot(xs[0].astype(jnp.bfloat16), w0_pieces[0],
                      preferred_element_type=jnp.float32)
        for p in range(1, n_pieces):
            acc = acc + jnp.dot(xs[p].astype(jnp.bfloat16), w0_pieces[p],
                                preferred_element_type=jnp.float32)
        acc = acc + b0
        for (w, b) in rest:
            acc = jnp.dot(act(acc).astype(jnp.bfloat16), w,
                          preferred_element_type=jnp.float32) + b
        return acc[:, :num_labels]

    tb = min(tb_cap, avail // per_row)
    tb = max(_SUBLANE, (tb // _SUBLANE) * _SUBLANE)
    tb = min(tb, _round_up(B, _SUBLANE))
    # v7x megacore: guarantee >= 2 grid steps whenever the batch allows it.
    if tb >= B and B > _SUBLANE:
        tb = max(_SUBLANE, _round_up(_cdiv(B, 2), _SUBLANE))
    grid_b = _cdiv(B, tb)                                   # ragged last block is fine

    vmem_limit = int(min(vmem_cap,
                         max(32 * 1024 * 1024,
                             2 * weight_bytes + tb * per_row + 16 * 1024 * 1024)))

    # ---- cost hint for the XLA scheduler ----
    flops = 2 * B * sum(dims[i] * dims[i + 1] for i in range(len(dims) - 1))
    transcendentals = B * sum(dims[1:-1]) if activation == "tanh" else 0
    bytes_accessed = B * sum_di * 4 + weight_bytes + B * pad_out * 2
    cost = pl.CostEstimate(flops=flops, transcendentals=transcendentals,
                           bytes_accessed=bytes_accessed)

    kernel = _make_discrim_kernel(n_pieces, n_linear, activation)
    flat_args = list(xs) + list(w0_pieces) + [b0]
    for wp, bp in rest:
        flat_args.extend([wp, bp])

    def _run(single_buffer_weights):
        def wspec(shape):
            if single_buffer_weights:
                return pl.BlockSpec(shape, lambda i: (0, 0), pipeline_mode=pl.Buffered(1))
            return pl.BlockSpec(shape, lambda i: (0, 0))

        in_specs = [pl.BlockSpec((tb, d), lambda i: (i, 0)) for d in piece_dims]
        for wp in w0_pieces:
            in_specs.append(wspec(wp.shape))
        in_specs.append(wspec(b0.shape))
        for wp, bp in rest:
            in_specs.append(wspec(wp.shape))
            in_specs.append(wspec(bp.shape))
        out_spec = pl.BlockSpec((tb, pad_out), lambda i: (i, 0))

        out = pl.pallas_call(
            kernel,
            out_shape=jax.ShapeDtypeStruct((B, pad_out), jnp.bfloat16),
            grid=(grid_b,),
            in_specs=in_specs,
            out_specs=out_spec,
            compiler_params=pltpu.CompilerParams(
                dimension_semantics=("parallel",),
                vmem_limit_bytes=vmem_limit,
            ),
            cost_estimate=cost,
        )(*flat_args)
        return jax.block_until_ready(out)

    try:
        out = _run(True)          # single-buffered resident weights (frees VMEM on v7x)
    except Exception:
        out = _run(False)         # fallback: default double-buffering

    return out[:B, :num_labels].astype(jnp.float32)


# --------------------------------------------------------------------------
# Pure-JAX f32 reference (matches the torch module)
# --------------------------------------------------------------------------
def _reference(xs, params, activation):
    x = jnp.concatenate(xs, axis=-1)
    act = _act_fn(activation)
    h = x
    for li, (w, b) in enumerate(params):
        h = h @ w + b
        if li < len(params) - 1:
            h = act(h)
    return h


if __name__ == "__main__":
    # Small shapes consistent with Discrim: two inputs concatenated along dim=-1.
    B = 2
    D1, D2 = 16, 16            # x_dim = 32 after concat
    HIDDEN_DIM = 32
    NUM_LABELS = 10
    LAYERS = 2                 # mlp(..., layers=2) -> 4 Linear layers total
    ACTIVATION = "relu"

    key = jax.random.PRNGKey(0)
    kx1, kx2, kp = jax.random.split(key, 3)
    x1 = jax.random.normal(kx1, (B, D1), jnp.float32)
    x2 = jax.random.normal(kx2, (B, D2), jnp.float32)
    params = init_discrim_params(kp, D1 + D2, HIDDEN_DIM, NUM_LABELS, LAYERS)

    prep = prepare_discrim_params(params, (D1, D2))   # one-time pad/cast of weights

    logits = discrim_forward((x1, x2), prep, activation=ACTIVATION)
    jax.block_until_ready(logits)

    ref = _reference((x1, x2), params, ACTIVATION)
    assert logits.shape == (B, NUM_LABELS)
    # bf16 matmul operands + bf16 output store (f32 accumulate) -> loosened tolerance.
    assert jnp.allclose(logits, ref, atol=5e-2, rtol=5e-2), float(
        jnp.max(jnp.abs(logits - ref))
    )

    print("KERNEL_OK")
</pallas_src>

<mosaic_0001>
module attributes {stable_mosaic.version = 11 : i64} {
  func.func @kernel(%arg0: i32, %arg1: memref<8x16xf32, #tpu.memory_space<vmem>>, %arg2: memref<8x16xf32, #tpu.memory_space<vmem>>, %arg3: memref<16x128xbf16, #tpu.memory_space<vmem>>, %arg4: memref<16x128xbf16, #tpu.memory_space<vmem>>, %arg5: memref<1x128xf32, #tpu.memory_space<vmem>>, %arg6: memref<128x128xbf16, #tpu.memory_space<vmem>>, %arg7: memref<1x128xf32, #tpu.memory_space<vmem>>, %arg8: memref<128x128xbf16, #tpu.memory_space<vmem>>, %arg9: memref<1x128xf32, #tpu.memory_space<vmem>>, %arg10: memref<128x128xbf16, #tpu.memory_space<vmem>>, %arg11: memref<1x128xf32, #tpu.memory_space<vmem>>, %arg12: memref<8x128xbf16, #tpu.memory_space<vmem>>) attributes {dimension_semantics = [#tpu.dimension_semantics<parallel>], iteration_bounds = array<i64: 1>, scalar_prefetch = 0 : i64, scratch_operands = 0 : i64, tpu.core_type = #tpu.core_type<tc>, window_params = [{transform_indices = @transform_0, window_bounds = array<i64: 8, 16>}, {transform_indices = @transform_1, window_bounds = array<i64: 8, 16>}, {pipeline_mode = #tpu.pipeline_mode<synchronous>, transform_indices = @transform_2, window_bounds = array<i64: 16, 128>}, {pipeline_mode = #tpu.pipeline_mode<synchronous>, transform_indices = @transform_3, window_bounds = array<i64: 16, 128>}, {pipeline_mode = #tpu.pipeline_mode<synchronous>, transform_indices = @transform_4, window_bounds = array<i64: 1, 128>}, {pipeline_mode = #tpu.pipeline_mode<synchronous>, transform_indices = @transform_5, window_bounds = array<i64: 128, 128>}, {pipeline_mode = #tpu.pipeline_mode<synchronous>, transform_indices = @transform_6, window_bounds = array<i64: 1, 128>}, {pipeline_mode = #tpu.pipeline_mode<synchronous>, transform_indices = @transform_7, window_bounds = array<i64: 128, 128>}, {pipeline_mode = #tpu.pipeline_mode<synchronous>, transform_indices = @transform_8, window_bounds = array<i64: 1, 128>}, {pipeline_mode = #tpu.pipeline_mode<synchronous>, transform_indices = @transform_9, window_bounds = array<i64: 128, 128>}, {pipeline_mode = #tpu.pipeline_mode<synchronous>, transform_indices = @transform_10, window_bounds = array<i64: 1, 128>}, {transform_indices = @transform_11, window_bounds = array<i64: 8, 128>}]} {
    %c0 = arith.constant 0 : index
    %c0_0 = arith.constant 0 : index
    %0 = vector.load %arg1[%c0, %c0_0] : memref<8x16xf32, #tpu.memory_space<vmem>>, vector<8x16xf32>
    %1 = arith.truncf %0 : vector<8x16xf32> to vector<8x16xbf16>
    %c0_1 = arith.constant 0 : index
    %c0_2 = arith.constant 0 : index
    %2 = vector.load %arg3[%c0_1, %c0_2] : memref<16x128xbf16, #tpu.memory_space<vmem>>, vector<16x128xbf16>
    %cst = arith.constant dense<0.000000e+00> : vector<8x128xf32>
    %3 = tpu.matmul %1, %2, %cst {dimension_numbers = #tpu.dot_dimension_numbers<[1], [0], [0], [1], [0, 0, 1, 1], [], []>} : vector<8x16xbf16>, vector<16x128xbf16>, vector<8x128xf32> -> vector<8x128xf32>
    %c0_3 = arith.constant 0 : index
    %c0_4 = arith.constant 0 : index
    %4 = vector.load %arg2[%c0_3, %c0_4] : memref<8x16xf32, #tpu.memory_space<vmem>>, vector<8x16xf32>
    %5 = arith.truncf %4 : vector<8x16xf32> to vector<8x16xbf16>
    %c0_5 = arith.constant 0 : index
    %c0_6 = arith.constant 0 : index
    %6 = vector.load %arg4[%c0_5, %c0_6] : memref<16x128xbf16, #tpu.memory_space<vmem>>, vector<16x128xbf16>
    %cst_7 = arith.constant dense<0.000000e+00> : vector<8x128xf32>
    %7 = tpu.matmul %5, %6, %cst_7 {dimension_numbers = #tpu.dot_dimension_numbers<[1], [0], [0], [1], [0, 0, 1, 1], [], []>} : vector<8x16xbf16>, vector<16x128xbf16>, vector<8x128xf32> -> vector<8x128xf32>
    %8 = arith.addf %3, %7 : vector<8x128xf32>
    %c0_8 = arith.constant 0 : index
    %c0_9 = arith.constant 0 : index
    %9 = vector.load %arg5[%c0_8, %c0_9] : memref<1x128xf32, #tpu.memory_space<vmem>>, vector<1x128xf32>
    %10 = vector.broadcast %9 : vector<1x128xf32> to vector<8x128xf32>
    %11 = arith.addf %8, %10 : vector<8x128xf32>
    %cst_10 = arith.constant 0.000000e+00 : f32
    %12 = vector.broadcast %cst_10 : f32 to vector<8x128xf32>
    %13 = arith.maximumf %11, %12 : vector<8x128xf32>
    %14 = arith.truncf %13 : vector<8x128xf32> to vector<8x128xbf16>
    %c0_11 = arith.constant 0 : index
    %c0_12 = arith.constant 0 : index
    %15 = vector.load %arg6[%c0_11, %c0_12] : memref<128x128xbf16, #tpu.memory_space<vmem>>, vector<128x128xbf16>
    %cst_13 = arith.constant dense<0.000000e+00> : vector<8x128xf32>
    %16 = tpu.matmul %14, %15, %cst_13 {dimension_numbers = #tpu.dot_dimension_numbers<[1], [0], [0], [1], [0, 0, 1, 1], [], []>} : vector<8x128xbf16>, vector<128x128xbf16>, vector<8x128xf32> -> vector<8x128xf32>
    %c0_14 = arith.constant 0 : index
    %c0_15 = arith.constant 0 : index
    %17 = vector.load %arg7[%c0_14, %c0_15] : memref<1x128xf32, #tpu.memory_space<vmem>>, vector<1x128xf32>
    %18 = vector.broadcast %17 : vector<1x128xf32> to vector<8x128xf32>
    %19 = arith.addf %16, %18 : vector<8x128xf32>
    %cst_16 = arith.constant 0.000000e+00 : f32
    %20 = vector.broadcast %cst_16 : f32 to vector<8x128xf32>
    %21 = arith.maximumf %19, %20 : vector<8x128xf32>
    %22 = arith.truncf %21 : vector<8x128xf32> to vector<8x128xbf16>
    %c0_17 = arith.constant 0 : index
    %c0_18 = arith.constant 0 : index
    %23 = vector.load %arg8[%c0_17, %c0_18] : memref<128x128xbf16, #tpu.memory_space<vmem>>, vector<128x128xbf16>
    %cst_19 = arith.constant dense<0.000000e+00> : vector<8x128xf32>
    %24 = tpu.matmul %22, %23, %cst_19 {dimension_numbers = #tpu.dot_dimension_numbers<[1], [0], [0], [1], [0, 0, 1, 1], [], []>} : vector<8x128xbf16>, vector<128x128xbf16>, vector<8x128xf32> -> vector<8x128xf32>
    %c0_20 = arith.constant 0 : index
    %c0_21 = arith.constant 0 : index
    %25 = vector.load %arg9[%c0_20, %c0_21] : memref<1x128xf32, #tpu.memory_space<vmem>>, vector<1x128xf32>
    %26 = vector.broadcast %25 : vector<1x128xf32> to vector<8x128xf32>
    %27 = arith.addf %24, %26 : vector<8x128xf32>
    %cst_22 = arith.constant 0.000000e+00 : f32
    %28 = vector.broadcast %cst_22 : f32 to vector<8x128xf32>
    %29 = arith.maximumf %27, %28 : vector<8x128xf32>
    %30 = arith.truncf %29 : vector<8x128xf32> to vector<8x128xbf16>
    %c0_23 = arith.constant 0 : index
    %c0_24 = arith.constant 0 : index
    %31 = vector.load %arg10[%c0_23, %c0_24] : memref<128x128xbf16, #tpu.memory_space<vmem>>, vector<128x128xbf16>
    %cst_25 = arith.constant dense<0.000000e+00> : vector<8x128xf32>
    %32 = tpu.matmul %30, %31, %cst_25 {dimension_numbers = #tpu.dot_dimension_numbers<[1], [0], [0], [1], [0, 0, 1, 1], [], []>} : vector<8x128xbf16>, vector<128x128xbf16>, vector<8x128xf32> -> vector<8x128xf32>
    %c0_26 = arith.constant 0 : index
    %c0_27 = arith.constant 0 : index
    %33 = vector.load %arg11[%c0_26, %c0_27] : memref<1x128xf32, #tpu.memory_space<vmem>>, vector<1x128xf32>
    %34 = vector.broadcast %33 : vector<1x128xf32> to vector<8x128xf32>
    %35 = arith.addf %32, %34 : vector<8x128xf32>
    %36 = arith.truncf %35 : vector<8x128xf32> to vector<8x128xbf16>
    %c0_28 = arith.constant 0 : index
    %c0_29 = arith.constant 0 : index
    %37 = vector.load %arg12[%c0_28, %c0_29] : memref<8x128xbf16, #tpu.memory_space<vmem>>, vector<8x128xbf16>
    tpu.vector_store %arg12[%c0_28, %c0_29], %36 {strides = array<i32>} : memref<8x128xbf16, #tpu.memory_space<vmem>>, vector<8x128xbf16>,
    return
  }
  func.func @transform_0(%arg0: i32) -> (i32, i32) {
    %c0_i32 = arith.constant 0 : i32
    %c0_i32_0 = arith.constant 0 : i32
    return %arg0, %c0_i32 : i32, i32
  }
  func.func @transform_1(%arg0: i32) -> (i32, i32) {
    %c0_i32 = arith.constant 0 : i32
    %c0_i32_0 = arith.constant 0 : i32
    return %arg0, %c0_i32 : i32, i32
  }
  func.func @transform_2(%arg0: i32) -> (i32, i32) {
    %c0_i32 = arith.constant 0 : i32
    %c0_i32_0 = arith.constant 0 : i32
    %c0_i32_1 = arith.constant 0 : i32
    return %c0_i32, %c0_i32_0 : i32, i32
  }
  func.func @transform_3(%arg0: i32) -> (i32, i32) {
    %c0_i32 = arith.constant 0 : i32
    %c0_i32_0 = arith.constant 0 : i32
    %c0_i32_1 = arith.constant 0 : i32
    return %c0_i32, %c0_i32_0 : i32, i32
  }
  func.func @transform_4(%arg0: i32) -> (i32, i32) {
    %c0_i32 = arith.constant 0 : i32
    %c0_i32_0 = arith.constant 0 : i32
    %c0_i32_1 = arith.constant 0 : i32
    return %c0_i32, %c0_i32_0 : i32, i32
  }
  func.func @transform_5(%arg0: i32) -> (i32, i32) {
    %c0_i32 = arith.constant 0 : i32
    %c0_i32_0 = arith.constant 0 : i32
    %c0_i32_1 = arith.constant 0 : i32
    return %c0_i32, %c0_i32_0 : i32, i32
  }
  func.func @transform_6(%arg0: i32) -> (i32, i32) {
    %c0_i32 = arith.constant 0 : i32
    %c0_i32_0 = arith.constant 0 : i32
    %c0_i32_1 = arith.constant 0 : i32
    return %c0_i32, %c0_i32_0 : i32, i32
  }
  func.func @transform_7(%arg0: i32) -> (i32, i32) {
    %c0_i32 = arith.constant 0 : i32
    %c0_i32_0 = arith.constant 0 : i32
    %c0_i32_1 = arith.constant 0 : i32
    return %c0_i32, %c0_i32_0 : i32, i32
  }
  func.func @transform_8(%arg0: i32) -> (i32, i32) {
    %c0_i32 = arith.constant 0 : i32
    %c0_i32_0 = arith.constant 0 : i32
    %c0_i32_1 = arith.constant 0 : i32
    return %c0_i32, %c0_i32_0 : i32, i32
  }
  func.func @transform_9(%arg0: i32) -> (i32, i32) {
    %c0_i32 = arith.constant 0 : i32
    %c0_i32_0 = arith.constant 0 : i32
    %c0_i32_1 = arith.constant 0 : i32
    return %c0_i32, %c0_i32_0 : i32, i32
  }
  func.func @transform_10(%arg0: i32) -> (i32, i32) {
    %c0_i32 = arith.constant 0 : i32
    %c0_i32_0 = arith.constant 0 : i32
    %c0_i32_1 = arith.constant 0 : i32
    return %c0_i32, %c0_i32_0 : i32, i32
  }
  func.func @transform_11(%arg0: i32) -> (i32, i32) {
    %c0_i32 = arith.constant 0 : i32
    %c0_i32_0 = arith.constant 0 : i32
    return %arg0, %c0_i32 : i32, i32
  }
}

module attributes {stable_mosaic.version = 11 : i64} {
  func.func @kernel(%arg0: i32, %arg1: memref<8x16xf32, #tpu.memory_space<vmem>>, %arg2: memref<8x16xf32, #tpu.memory_space<vmem>>, %arg3: memref<16x128xbf16, #tpu.memory_space<vmem>>, %arg4: memref<16x128xbf16, #tpu.memory_space<vmem>>, %arg5: memref<1x128xf32, #tpu.memory_space<vmem>>, %arg6: memref<128x128xbf16, #tpu.memory_space<vmem>>, %arg7: memref<1x128xf32, #tpu.memory_space<vmem>>, %arg8: memref<128x128xbf16, #tpu.memory_space<vmem>>, %arg9: memref<1x128xf32, #tpu.memory_space<vmem>>, %arg10: memref<128x128xbf16, #tpu.memory_space<vmem>>, %arg11: memref<1x128xf32, #tpu.memory_space<vmem>>, %arg12: memref<8x128xbf16, #tpu.memory_space<vmem>>) attributes {dimension_semantics = [#tpu.dimension_semantics<parallel>], iteration_bounds = array<i64: 1>, scalar_prefetch = 0 : i64, scratch_operands = 0 : i64, tpu.core_type = #tpu.core_type<tc>, window_params = [{transform_indices = @transform_0, window_bounds = array<i64: 8, 16>}, {transform_indices = @transform_1, window_bounds = array<i64: 8, 16>}, {pipeline_mode = #tpu.pipeline_mode<synchronous>, transform_indices = @transform_2, window_bounds = array<i64: 16, 128>}, {pipeline_mode = #tpu.pipeline_mode<synchronous>, transform_indices = @transform_3, window_bounds = array<i64: 16, 128>}, {pipeline_mode = #tpu.pipeline_mode<synchronous>, transform_indices = @transform_4, window_bounds = array<i64: 1, 128>}, {pipeline_mode = #tpu.pipeline_mode<synchronous>, transform_indices = @transform_5, window_bounds = array<i64: 128, 128>}, {pipeline_mode = #tpu.pipeline_mode<synchronous>, transform_indices = @transform_6, window_bounds = array<i64: 1, 128>}, {pipeline_mode = #tpu.pipeline_mode<synchronous>, transform_indices = @transform_7, window_bounds = array<i64: 128, 128>}, {pipeline_mode = #tpu.pipeline_mode<synchronous>, transform_indices = @transform_8, window_bounds = array<i64: 1, 128>}, {pipeline_mode = #tpu.pipeline_mode<synchronous>, transform_indices = @transform_9, window_bounds = array<i64: 128, 128>}, {pipeline_mode = #tpu.pipeline_mode<synchronous>, transform_indices = @transform_10, window_bounds = array<i64: 1, 128>}, {transform_indices = @transform_11, window_bounds = array<i64: 8, 128>}]} {
    %c0 = arith.constant 0 : index
    %c0_0 = arith.constant 0 : index
    %0 = vector.load %arg1[%c0, %c0_0] : memref<8x16xf32, #tpu.memory_space<vmem>>, vector<8x16xf32>
    %1 = arith.truncf %0 : vector<8x16xf32> to vector<8x16xbf16>
    %c0_1 = arith.constant 0 : index
    %c0_2 = arith.constant 0 : index
    %2 = vector.load %arg3[%c0_1, %c0_2] : memref<16x128xbf16, #tpu.memory_space<vmem>>, vector<16x128xbf16>
    %cst = arith.constant dense<0.000000e+00> : vector<8x128xf32>
    %3 = tpu.matmul %1, %2, %cst {dimension_numbers = #tpu.dot_dimension_numbers<[1], [0], [0], [1], [0, 0, 1, 1], [], []>} : vector<8x16xbf16>, vector<16x128xbf16>, vector<8x128xf32> -> vector<8x128xf32>
    %c0_3 = arith.constant 0 : index
    %c0_4 = arith.constant 0 : index
    %4 = vector.load %arg2[%c0_3, %c0_4] : memref<8x16xf32, #tpu.memory_space<vmem>>, vector<8x16xf32>
    %5 = arith.truncf %4 : vector<8x16xf32> to vector<8x16xbf16>
    %c0_5 = arith.constant 0 : index
    %c0_6 = arith.constant 0 : index
    %6 = vector.load %arg4[%c0_5, %c0_6] : memref<16x128xbf16, #tpu.memory_space<vmem>>, vector<16x128xbf16>
    %cst_7 = arith.constant dense<0.000000e+00> : vector<8x128xf32>
    %7 = tpu.matmul %5, %6, %cst_7 {dimension_numbers = #tpu.dot_dimension_numbers<[1], [0], [0], [1], [0, 0, 1, 1], [], []>} : vector<8x16xbf16>, vector<16x128xbf16>, vector<8x128xf32> -> vector<8x128xf32>
    %8 = arith.addf %3, %7 : vector<8x128xf32>
    %c0_8 = arith.constant 0 : index
    %c0_9 = arith.constant 0 : index
    %9 = vector.load %arg5[%c0_8, %c0_9] : memref<1x128xf32, #tpu.memory_space<vmem>>, vector<1x128xf32>
    %10 = vector.broadcast %9 : vector<1x128xf32> to vector<8x128xf32>
    %11 = arith.addf %8, %10 : vector<8x128xf32>
    %cst_10 = arith.constant 0.000000e+00 : f32
    %12 = vector.broadcast %cst_10 : f32 to vector<8x128xf32>
    %13 = arith.maximumf %11, %12 : vector<8x128xf32>
    %14 = arith.truncf %13 : vector<8x128xf32> to vector<8x128xbf16>
    %c0_11 = arith.constant 0 : index
    %c0_12 = arith.constant 0 : index
    %15 = vector.load %arg6[%c0_11, %c0_12] : memref<128x128xbf16, #tpu.memory_space<vmem>>, vector<128x128xbf16>
    %cst_13 = arith.constant dense<0.000000e+00> : vector<8x128xf32>
    %16 = tpu.matmul %14, %15, %cst_13 {dimension_numbers = #tpu.dot_dimension_numbers<[1], [0], [0], [1], [0, 0, 1, 1], [], []>} : vector<8x128xbf16>, vector<128x128xbf16>, vector<8x128xf32> -> vector<8x128xf32>
    %c0_14 = arith.constant 0 : index
    %c0_15 = arith.constant 0 : index
    %17 = vector.load %arg7[%c0_14, %c0_15] : memref<1x128xf32, #tpu.memory_space<vmem>>, vector<1x128xf32>
    %18 = vector.broadcast %17 : vector<1x128xf32> to vector<8x128xf32>
    %19 = arith.addf %16, %18 : vector<8x128xf32>
    %cst_16 = arith.constant 0.000000e+00 : f32
    %20 = vector.broadcast %cst_16 : f32 to vector<8x128xf32>
    %21 = arith.maximumf %19, %20 : vector<8x128xf32>
    %22 = arith.truncf %21 : vector<8x128xf32> to vector<8x128xbf16>
    %c0_17 = arith.constant 0 : index
    %c0_18 = arith.constant 0 : index
    %23 = vector.load %arg8[%c0_17, %c0_18] : memref<128x128xbf16, #tpu.memory_space<vmem>>, vector<128x128xbf16>
    %cst_19 = arith.constant dense<0.000000e+00> : vector<8x128xf32>
    %24 = tpu.matmul %22, %23, %cst_19 {dimension_numbers = #tpu.dot_dimension_numbers<[1], [0], [0], [1], [0, 0, 1, 1], [], []>} : vector<8x128xbf16>, vector<128x128xbf16>, vector<8x128xf32> -> vector<8x128xf32>
    %c0_20 = arith.constant 0 : index
    %c0_21 = arith.constant 0 : index
    %25 = vector.load %arg9[%c0_20, %c0_21] : memref<1x128xf32, #tpu.memory_space<vmem>>, vector<1x128xf32>
    %26 = vector.broadcast %25 : vector<1x128xf32> to vector<8x128xf32>
    %27 = arith.addf %24, %26 : vector<8x128xf32>
    %cst_22 = arith.constant 0.000000e+00 : f32
    %28 = vector.broadcast %cst_22 : f32 to vector<8x128xf32>
    %29 = arith.maximumf %27, %28 : vector<8x128xf32>
    %30 = arith.truncf %29 : vector<8x128xf32> to vector<8x128xbf16>
    %c0_23 = arith.constant 0 : index
    %c0_24 = arith.constant 0 : index
    %31 = vector.load %arg10[%c0_23, %c0_24] : memref<128x128xbf16, #tpu.memory_space<vmem>>, vector<128x128xbf16>
    %cst_25 = arith.constant dense<0.000000e+00> : vector<8x128xf32>
    %32 = tpu.matmul %30, %31, %cst_25 {dimension_numbers = #tpu.dot_dimension_numbers<[1], [0], [0], [1], [0, 0, 1, 1], [], []>} : vector<8x128xbf16>, vector<128x128xbf16>, vector<8x128xf32> -> vector<8x128xf32>
    %c0_26 = arith.constant 0 : index
    %c0_27 = arith.constant 0 : index
    %33 = vector.load %arg11[%c0_26, %c0_27] : memref<1x128xf32, #tpu.memory_space<vmem>>, vector<1x128xf32>
    %34 = vector.broadcast %33 : vector<1x128xf32> to vector<8x128xf32>
    %35 = arith.addf %32, %34 : vector<8x128xf32>
    %36 = arith.truncf %35 : vector<8x128xf32> to vector<8x128xbf16>
    %c0_28 = arith.constant 0 : index
    %c0_29 = arith.constant 0 : index
    %37 = vector.load %arg12[%c0_28, %c0_29] : memref<8x128xbf16, #tpu.memory_space<vmem>>, vector<8x128xbf16>
    tpu.vector_store %arg12[%c0_28, %c0_29], %36 {strides = array<i32>} : memref<8x128xbf16, #tpu.memory_space<vmem>>, vector<8x128xbf16>,
    return
  }
  func.func @transform_0(%arg0: i32) -> (i32, i32) {
    %c0_i32 = arith.constant 0 : i32
    %c0_i32_0 = arith.constant 0 : i32
    return %arg0, %c0_i32 : i32, i32
  }
  func.func @transform_1(%arg0: i32) -> (i32, i32) {
    %c0_i32 = arith.constant 0 : i32
    %c0_i32_0 = arith.constant 0 : i32
    return %arg0, %c0_i32 : i32, i32
  }
  func.func @transform_2(%arg0: i32) -> (i32, i32) {
    %c0_i32 = arith.constant 0 : i32
    %c0_i32_0 = arith.constant 0 : i32
    %c0_i32_1 = arith.constant 0 : i32
    return %c0_i32, %c0_i32_0 : i32, i32
  }
  func.func @transform_3(%arg0: i32) -> (i32, i32) {
    %c0_i32 = arith.constant 0 : i32
    %c0_i32_0 = arith.constant 0 : i32
    %c0_i32_1 = arith.constant 0 : i32
    return %c0_i32, %c0_i32_0 : i32, i32
  }
  func.func @transform_4(%arg0: i32) -> (i32, i32) {
    %c0_i32 = arith.constant 0 : i32
    %c0_i32_0 = arith.constant 0 : i32
    %c0_i32_1 = arith.constant 0 : i32
    return %c0_i32, %c0_i32_0 : i32, i32
  }
  func.func @transform_5(%arg0: i32) -> (i32, i32) {
    %c0_i32 = arith.constant 0 : i32
    %c0_i32_0 = arith.constant 0 : i32
    %c0_i32_1 = arith.constant 0 : i32
    return %c0_i32, %c0_i32_0 : i32, i32
  }
  func.func @transform_6(%arg0: i32) -> (i32, i32) {
    %c0_i32 = arith.constant 0 : i32
    %c0_i32_0 = arith.constant 0 : i32
    %c0_i32_1 = arith.constant 0 : i32
    return %c0_i32, %c0_i32_0 : i32, i32
  }
  func.func @transform_7(%arg0: i32) -> (i32, i32) {
    %c0_i32 = arith.constant 0 : i32
    %c0_i32_0 = arith.constant 0 : i32
    %c0_i32_1 = arith.constant 0 : i32
    return %c0_i32, %c0_i32_0 : i32, i32
  }
  func.func @transform_8(%arg0: i32) -> (i32, i32) {
    %c0_i32 = arith.constant 0 : i32
    %c0_i32_0 = arith.constant 0 : i32
    %c0_i32_1 = arith.constant 0 : i32
    return %c0_i32, %c0_i32_0 : i32, i32
  }
  func.func @transform_9(%arg0: i32) -> (i32, i32) {
    %c0_i32 = arith.constant 0 : i32
    %c0_i32_0 = arith.constant 0 : i32
    %c0_i32_1 = arith.constant 0 : i32
    return %c0_i32, %c0_i32_0 : i32, i32
  }
  func.func @transform_10(%arg0: i32) -> (i32, i32) {
    %c0_i32 = arith.constant 0 : i32
    %c0_i32_0 = arith.constant 0 : i32
    %c0_i32_1 = arith.constant 0 : i32
    return %c0_i32, %c0_i32_0 : i32, i32
  }
  func.func @transform_11(%arg0: i32) -> (i32, i32) {
    %c0_i32 = arith.constant 0 : i32
    %c0_i32_0 = arith.constant 0 : i32
    return %arg0, %c0_i32 : i32, i32
  }
}

</mosaic_0001>

<bundles_post_ra>
// kernel: tpu_custom_call.1
= control target key start
LH: loop header
LB: loop body
LE: loop exit
PB: predicated region body
PF: predicated region fallthrough
CT: control target
= control target key end

     0   :  { %16 = vsyncpa [#allocation3], 0  ;;  %s1159_s0 = inlined_call_operand.hbm [shape: f32[2,16], index: 0, kind: input, shape index: {}]   ;;  %s1160_s1 = inlined_call_operand.hbm [shape: f32[2,16], index: 1, kind: input, shape index: {}]   ;;  %s1161_s2 = inlined_call_operand.hbm [shape: bf16[16,128], index: 2, kind: input, shape index: {}]   ;;  %s1162_s3 = inlined_call_operand.hbm [shape: bf16[16,128], index: 3, kind: input, shape index: {}]   ;;  %s1163_s4 = inlined_call_operand.vmem [shape: f32[1,128], index: 4, kind: input, shape index: {}]   ;;  %s1164_s5 = inlined_call_operand.hbm [shape: bf16[128,128], index: 5, kind: input, shape index: {}]   ;;  %s1165_s6 = inlined_call_operand.vmem [shape: f32[1,128], index: 6, kind: input, shape index: {}]   ;;  %s1166_s7 = inlined_call_operand.hbm [shape: bf16[128,128], index: 7, kind: input, shape index: {}]   ;;  %s1167_s8 = inlined_call_operand.vmem [shape: f32[1,128], index: 8, kind: input, shape index: {}]   ;;  %s1168_s9 = inlined_call_operand.hbm [shape: bf16[128,128], index: 9, kind: input, shape index: {}]   ;;  %s1169_s10 = inlined_call_operand.vmem [shape: f32[1,128], index: 10, kind: input, shape index: {}]   ;;  %s1170_s11 = inlined_call_operand.hbm [shape: bf16[2,128], index: 11, kind: output, shape index: {}]  }
   0x1   :  { %17 = vsyncpa [#allocation6], 0 }
   0x2   :  { %18 = vsyncpa [#allocation9], 0 }
   0x3   :  { %19 = vsyncpa [#allocation12], 0 }
   0x4   :  { %20 = vsyncpa [#allocation4], 0 }
   0x5   :  { %25 = vsyncadd [#allocation3], 96  ;;  %s993_s17 = smov [#allocation2]  }
   0x6   :  { %s26_s18 = sshll.u32 %s993_s17, 4  ;;  %s27_s18 = int_to_ptr.vmem [resolvable:$true] %s26_s18 }
   0x7   :  { %s831_s19 = scalar_lea.vmem %s27_s18, 32  ;;  %s835_s20 = scalar_lea.vmem %s27_s18, 128 }
   0x8   :  { %p832_p0 = scmp.ne.s32.totalorder %s27_s18, %s831_s19  ;;  %p836_p1 = scmp.lt.s32.totalorder %s27_s18, %s27_s18 }
   0x9   :  { %p837_p2 = scmp.lt.s32.totalorder %s835_s20, %s831_s19 }
   0xb   :  { %p838_p3 = por %p837_p2, %p836_p1 }
   0xd   :  { %p839_p4 = pnand %p838_p3, %p832_p0 }
   0xf   :  { %842 = shalt.err (!%p839_p4)
}
  0x10   :  { %s994_s21 = smov 32   ;;  %s995_s22 = smov 2  }
  0x11   :  { %32 = dma.hbm_to_vmem [thread:$0]  %s1159_s0, 32, %s27_s18, [#allocation3], %s994_s21, %s994_s21, %s995_s22  }
  0x12   :  { %37 = vsyncadd [#allocation6], 96  ;;  %s996_s25 = smov [#allocation5]  }
  0x13   :  { %s38_s26 = sshll.u32 %s996_s25, 4  ;;  %s39_s26 = int_to_ptr.vmem [resolvable:$true] %s38_s26 }
  0x14   :  { %s851_s27 = scalar_lea.vmem %s39_s26, 32  ;;  %s855_s28 = scalar_lea.vmem %s39_s26, 128 }
  0x15   :  { %p852_p5 = scmp.ne.s32.totalorder %s39_s26, %s851_s27  ;;  %p856_p6 = scmp.lt.s32.totalorder %s39_s26, %s39_s26 }
  0x16   :  { %p857_p7 = scmp.lt.s32.totalorder %s855_s28, %s851_s27 }
  0x18   :  { %p858_p8 = por %p857_p7, %p856_p6 }
  0x1a   :  { %p859_p9 = pnand %p858_p8, %p852_p5 }
  0x1c   :  { %862 = shalt.err (!%p859_p9)
}
  0x1d   :  { %44 = dma.hbm_to_vmem [thread:$0]  %s1160_s1, 32, %s39_s26, [#allocation6], %s994_s21, %s994_s21, %s995_s22  }
  0x1e   :  { %s997_s12 = smov [#allocation8]   ;;  %s998_s0 = smov [#allocation11]  }
  0x1f   :  { %s62_s13 = sshll.u32 %s997_s12, 4  ;;  %s90_s14 = sshll.u32 %s998_s0, 4  ;;  %s63_s13 = int_to_ptr.vmem [resolvable:$true] %s62_s13  ;;  %s91_s14 = int_to_ptr.vmem [resolvable:$true] %s90_s14 }
  0x20   :  { %s871_s15 = scalar_lea.vmem %s63_s13, 128  ;;  %p876_p11 = scmp.lt.s32.totalorder %s63_s13, %s63_s13 }
  0x21   :  { %p872_p10 = scmp.ne.s32.totalorder %s63_s13, %s871_s15  ;;  %p877_p12 = scmp.lt.s32.totalorder %s871_s15, %s871_s15 }
  0x23   :  { %p878_p13 = por %p877_p12, %p876_p11 }
  0x25   :  { %p879_p0 = pnand %p878_p13, %p872_p10 }
  0x27   :  { %882 = shalt.err (!%p879_p0)
}
  0x28   :  { %s999_s16 = smov 64   ;;  %s1000_s17 = smov 4  }
  0x29   :  { %68 = dma.hbm_to_vmem [thread:$0]  %s1162_s3, 128, %s63_s13, [#allocation9], %s999_s16, %s999_s16, %s1000_s17  }
  0x2a   :  { %s891_s1 = scalar_lea.vmem %s91_s14, 1024  ;;  %p896_p2 = scmp.lt.s32.totalorder %s91_s14, %s91_s14 }
  0x2b   :  { %p892_p1 = scmp.ne.s32.totalorder %s91_s14, %s891_s1  ;;  %p897_p3 = scmp.lt.s32.totalorder %s891_s1, %s891_s1 }
  0x2d   :  { %p898_p4 = por %p897_p3, %p896_p2 }
  0x2f   :  { %p899_p5 = pnand %p898_p4, %p892_p1 }
  0x31   :  { %902 = shalt.err (!%p899_p5)
}
  0x32   :  { %96 = dma.hbm_to_vmem [thread:$0]  %s1166_s7, 1024, %s91_s14, [#allocation12], %s999_s16, %s999_s16, %s1000_s17  }
  0x33   :  { %s1001_s22 = smov [#allocation7]   ;;  %s1002_s24 = smov [#allocation10]  }
  0x34   :  { %s50_s23 = sshll.u32 %s1001_s22, 4  ;;  %s76_s3 = sshll.u32 %s1002_s24, 4  ;;  %s51_s23 = int_to_ptr.vmem [resolvable:$true] %s50_s23  ;;  %s77_s3 = int_to_ptr.vmem [resolvable:$true] %s76_s3 }
  0x35   :  { %s911_s25 = scalar_lea.vmem %s51_s23, 128  ;;  %p916_p7 = scmp.lt.s32.totalorder %s51_s23, %s51_s23 }
  0x36   :  { %p912_p6 = scmp.ne.s32.totalorder %s51_s23, %s911_s25  ;;  %p917_p8 = scmp.lt.s32.totalorder %s911_s25, %s911_s25 }
  0x38   :  { %p918_p9 = por %p917_p8, %p916_p7 }
  0x3a   :  { %p919_p10 = pnand %p918_p9, %p912_p6 }
  0x3c   :  { %922 = shalt.err (!%p919_p10)
}
  0x3d   :  { %56 = dma.hbm_to_vmem [thread:$0]  %s1161_s2, 128, %s51_s23, [#allocation6], %s999_s16, %s999_s16, %s1000_s17  }
  0x3e   :  { %s931_s7 = scalar_lea.vmem %s77_s3, 1024  ;;  %p936_p12 = scmp.lt.s32.totalorder %s77_s3, %s77_s3 }
  0x3f   :  { %p932_p11 = scmp.ne.s32.totalorder %s77_s3, %s931_s7  ;;  %p937_p13 = scmp.lt.s32.totalorder %s931_s7, %s931_s7 }
  0x41   :  { %p938_p0 = por %p937_p13, %p936_p12 }
  0x43   :  { %p939_p1 = pnand %p938_p0, %p932_p11 }
  0x45   :  { %942 = shalt.err (!%p939_p1)
}
  0x46   :  { %82 = dma.hbm_to_vmem [thread:$0]  %s1164_s5, 1024, %s77_s3, [#allocation9], %s999_s16, %s999_s16, %s1000_s17  }
  0x47   :  { %s1003_s30 = smov [#allocation13]  }
  0x48   :  { %s104_s12 = sshll.u32 %s1003_s30, 4  ;;  %s105_s12 = int_to_ptr.vmem [resolvable:$true] %s104_s12 }
  0x49   :  { %s951_s13 = scalar_lea.vmem %s105_s12, 1024  ;;  %p956_p3 = scmp.lt.s32.totalorder %s105_s12, %s105_s12 }
  0x4a   :  { %p952_p2 = scmp.ne.s32.totalorder %s105_s12, %s951_s13  ;;  %p957_p4 = scmp.lt.s32.totalorder %s951_s13, %s951_s13 }
  0x4c   :  { %p958_p5 = por %p957_p4, %p956_p3 }
  0x4e   :  { %p959_p6 = pnand %p958_p5, %p952_p2 }
  0x50   :  { %962 = shalt.err (!%p959_p6)
}
  0x51   :  { %110 = dma.hbm_to_vmem [thread:$0]  %s1168_s9, 1024, %s105_s12, [#allocation12], %s999_s16, %s999_s16, %s1000_s17  }
  0x52   :  { %983 = dma.done.wait [#allocation3], 128  }
  0x53   :  { %984 = vsyncadd [#allocation3], 4294967168 }
  0x54   :  { %985 = dma.done.wait [#allocation6], 256  }
  0x55   :  { %986 = vsyncadd [#allocation6], 4294967040 }
  0x56   :  { %987 = dma.done.wait [#allocation9], 1152  }
  0x57   :  { %988 = vsyncadd [#allocation9], 4294966144 }
  0x58   :  { %989 = dma.done.wait [#allocation12], 2048  }
  0x59   :  { %990 = vsyncadd [#allocation12], 4294965248  ;;  %v1004_v0 = vmov 0.0   ;;  %vm1005_vm0 = vmmov 0   ;;  %v797_v1 = vld [vmem:[#allocation8] sm:$0xff]   ;;  %v139_v2 = vld [vmem:[#allocation5] sm:$0xff]  ;;  %v594_v62 = vlaneseq }
  0x5a   :  { %708 = vmatprep.subr.bf16.mxu1 %v1004_v0  ;;  %710 = vmatprep.mubr.msk.bf16.mxu1 %vm1005_vm0, %v1004_v0  ;;  %v140_v3 = vpack.c.bf16 %v139_v2, %v139_v2  ;;  %vm149_vm1 = vcmask 130048   ;;  %v798_v4 = vld [vmem:[#allocation7] sm:$0xff]   ;;  %v799_v5 = vld [vmem:[#allocation10 + $0x38] sm:$0xff]   ;;  %v135_v7 = vld [vmem:[#allocation2] sm:$0xff]  ;;  %v1006_v60 = vmov 1966171168  }
  0x5b   :  { %720 = vmatprep.subr.bf16.mxu0 %v1004_v0  ;;  %736 = vmatprep.mubr.msk.bf16.mxu0 %vm1005_vm0, %v1004_v0  ;;  %v800_v6 = vld [vmem:[#allocation10 + $0x30] sm:$0xff]   ;;  %v801_v8 = vld [vmem:[#allocation10 + $0x28] sm:$0xff]   ;;  %v136_v9 = vpack.c.bf16 %v135_v7, %v135_v7  ;;  %v802_v10 = vld [vmem:[#allocation10 + $0x20] sm:$0xff]   ;;  %v592_v61 = vunpack.c.l.s4 %v1006_v60 }
  0x5c   :  { %709 = vmatpush3.bf16.msra.mxu1 %v797_v1  ;;  %721 = vmatpush3.bf16.msra.mxu0 %v799_v5  ;;  %v803_v11 = vld [vmem:[#allocation10 + $0x18] sm:$0xff]   ;;  %v804_v12 = vld [vmem:[#allocation10 + $0x10] sm:$0xff]   ;;  %v805_v13 = vld [vmem:[#allocation10 + $0x8] sm:$0xff]   ;;  %v595_v1 = vshrl.u32 %v594_v62, 7 }
  0x5d   :  { %714 = vmatprep.subr.bf16.mxu1 %v1004_v0  ;;  %722 = vmatprep.subr.bf16.mxu0 %v1004_v0  ;;  %v806_v14 = vld [vmem:[#allocation10] sm:$0xff]   ;;  %v807_v15 = vld [vmem:[#allocation11 + $0x38] sm:$0xff]   ;;  %v808_v16 = vld [vmem:[#allocation11 + $0x30] sm:$0xff]   ;;  %v593_v63 = vunpack.c.0.s8 %v592_v61 }
  0x5e   :  { %v809_v17 = vld [vmem:[#allocation11 + $0x28] sm:$0xff]   ;;  %v810_v18 = vld [vmem:[#allocation11 + $0x20] sm:$0xff]   ;;  %v811_v19 = vld [vmem:[#allocation11 + $0x18] sm:$0xff]  }
  0x5f   :  { %711 = vmatmul.mubr.msk.bf16.vlgmr.msra.gmra.mxu1 %vm149_vm1, %v140_v3  ;;  %v812_v20 = vld [vmem:[#allocation11 + $0x10] sm:$0xff]   ;;  %v647_v26 = vld [vmem:[%s1163_s4] ss:$0 sm:$0xff]  ;;  %v813_v34 = vld [vmem:[#allocation11 + $0x8] sm:$0xff]  }
  0x60   :  { %715 = vmatpush3.bf16.msra.mxu1 %v798_v4  ;;  %716 = vmatprep.mubr.msk.bf16.mxu1 %vm1005_vm0, %v1004_v0  ;;  %v814_v35 = vld [vmem:[#allocation11] sm:$0xff]   ;;  %v815_v36 = vld [vmem:[#allocation13 + $0x38] sm:$0xff]   ;;  %v816_v37 = vld [vmem:[#allocation13 + $0x30] sm:$0xff]   ;;  %v596_v4 = vsub.s32 %v593_v63, %v595_v1 }
  0x61   :  { %740 = vmatprep.subr.bf16.mxu1 %v1004_v0  ;;  %723 = vmatpush3.bf16.msra.mxu0 %v800_v6  ;;  %v817_v38 = vld [vmem:[#allocation13 + $0x28] sm:$0xff]   ;;  %v818_v39 = vld [vmem:[#allocation13 + $0x20] sm:$0xff]   ;;  %v819_v40 = vld [vmem:[#allocation13 + $0x18] sm:$0xff]  }
  0x62   :  { %724 = vmatprep.subr.bf16.mxu0 %v1004_v0  ;;  %v820_v41 = vld [vmem:[#allocation13 + $0x10] sm:$0xff]   ;;  %v648_v42 = vld [vmem:[%s1165_s6] ss:$0 sm:$0xff]  ;;  %v821_v50 = vld [vmem:[#allocation13 + $0x8] sm:$0xff]  }
  0x63   :  { %v822_v51 = vld [vmem:[#allocation13] sm:$0xff]  }
  0x64   :  { %v657_v52 = vld [vmem:[%s1167_s8] ss:$0 sm:$0xff] }
  0x65   :  { %725 = vmatpush3.bf16.msra.mxu0 %v801_v8 }
  0x66   :  { %726 = vmatprep.subr.bf16.mxu0 %v1004_v0 }
  0x67   :  { %717 = vmatmul.mubr.msk.bf16.vlgmr.msra.gmra.mxu1 %vm149_vm1, %v136_v9 }
  0x68   :  { %756 = vmatprep.mubr.msk.bf16.mxu1 %vm1005_vm0, %v1004_v0  ;;  %741 = vmatpush3.bf16.msra.mxu1 %v807_v15 }
  0x69   :  { %727 = vmatpush3.bf16.msra.mxu0 %v802_v10  ;;  %742 = vmatprep.subr.bf16.mxu1 %v1004_v0 }
  0x6a   :  { %728 = vmatprep.subr.bf16.mxu0 %v1004_v0 }
  0x6c   :  { %743 = vmatpush3.bf16.msra.mxu1 %v808_v16 }
  0x6d   :  { %729 = vmatpush3.bf16.msra.mxu0 %v803_v11  ;;  %744 = vmatprep.subr.bf16.mxu1 %v1004_v0 }
  0x6e   :  { %730 = vmatprep.subr.bf16.mxu0 %v1004_v0 }
  0x70   :  { %745 = vmatpush3.bf16.msra.mxu1 %v809_v17 }
  0x71   :  { %731 = vmatpush3.bf16.msra.mxu0 %v804_v12  ;;  %746 = vmatprep.subr.bf16.mxu1 %v1004_v0 }
  0x72   :  { %732 = vmatprep.subr.bf16.mxu0 %v1004_v0 }
  0x74   :  { %747 = vmatpush3.bf16.msra.mxu1 %v810_v18 }
  0x75   :  { %733 = vmatpush3.bf16.msra.mxu0 %v805_v13  ;;  %748 = vmatprep.subr.bf16.mxu1 %v1004_v0 }
  0x76   :  { %734 = vmatprep.subr.bf16.mxu0 %v1004_v0 }
  0x78   :  { %749 = vmatpush3.bf16.msra.mxu1 %v811_v19 }
  0x79   :  { %735 = vmatpush3.bf16.msra.mxu0 %v806_v14  ;;  %750 = vmatprep.subr.bf16.mxu1 %v1004_v0 }
  0x7a   :  { %760 = vmatprep.subr.bf16.mxu0 %v1004_v0 }
  0x7c   :  { %751 = vmatpush3.bf16.msra.mxu1 %v812_v20 }
  0x7d   :  { %752 = vmatprep.subr.bf16.mxu1 %v1004_v0 }
  0x80   :  { %753 = vmatpush3.bf16.msra.mxu1 %v813_v34 }
  0x81   :  { %754 = vmatprep.subr.bf16.mxu1 %v1004_v0 }
  0x84   :  { %755 = vmatpush3.bf16.msra.mxu1 %v814_v35 }
 0x11f   :  { %v187_v21 = vpop.f32.mrf.mxu1 }
 0x121   :  { %v712_v22 = vpop.f32.mrf.mxu1 }
 0x123   :  { %v190_v23 = vpop.f32.mrf.mxu1 }
 0x125   :  { %v713_v24 = vpop.f32.mrf.mxu1 }
 0x127   :  { %v236_v25 = vpop.f32.mrf.mxu1 }
 0x128   :  { %v237_v27 = vadd.f32 %v236_v25, %v187_v21 }
 0x129   :  { %v718_v28 = vpop.f32.mrf.mxu1 }
 0x12a   :  { %v249_v29 = vadd.f32 %v647_v26, %v237_v27 }
 0x12b   :  { %v239_v30 = vpop.f32.mrf.mxu1 }
 0x12c   :  { %v250_v31 = vmax.f32 %v249_v29, 0.0 }
 0x12d   :  { %v719_v32 = vpop.f32.mrf.mxu1 }
 0x12e   :  { %v251_v33 = vpack.c.bf16 %v250_v31, %v250_v31 }
 0x130   :  { %737 = vmatmul.mubr.bf16.vlgmr.msra.gmra.mxu0 %v251_v33 }
 0x131   :  { %776 = vmatprep.mubr.msk.bf16.mxu0 %vm1005_vm0, %v1004_v0  ;;  %761 = vmatpush3.bf16.msra.mxu0 %v815_v36 }
 0x132   :  { %762 = vmatprep.subr.bf16.mxu0 %v1004_v0 }
 0x135   :  { %763 = vmatpush3.bf16.msra.mxu0 %v816_v37 }
 0x136   :  { %764 = vmatprep.subr.bf16.mxu0 %v1004_v0 }
 0x139   :  { %765 = vmatpush3.bf16.msra.mxu0 %v817_v38 }
 0x13a   :  { %766 = vmatprep.subr.bf16.mxu0 %v1004_v0 }
 0x13d   :  { %767 = vmatpush3.bf16.msra.mxu0 %v818_v39 }
 0x13e   :  { %768 = vmatprep.subr.bf16.mxu0 %v1004_v0 }
 0x141   :  { %769 = vmatpush3.bf16.msra.mxu0 %v819_v40 }
 0x142   :  { %770 = vmatprep.subr.bf16.mxu0 %v1004_v0 }
 0x145   :  { %771 = vmatpush3.bf16.msra.mxu0 %v820_v41 }
 0x146   :  { %772 = vmatprep.subr.bf16.mxu0 %v1004_v0 }
 0x149   :  { %773 = vmatpush3.bf16.msra.mxu0 %v821_v50 }
 0x14a   :  { %774 = vmatprep.subr.bf16.mxu0 %v1004_v0  ;;  %v666_v0 = vld [vmem:[%s1169_s10] ss:$0 sm:$0xff] }
 0x14d   :  { %775 = vmatpush3.bf16.msra.mxu0 %v822_v51 }
 0x1f0   :  { %v357_v43 = vpop.f32.mrf.mxu0 }
 0x1f1   :  { %v358_v44 = vadd.f32 %v648_v42, %v357_v43 }
 0x1f2   :  { %v738_v45 = vpop.f32.mrf.mxu0 }
 0x1f3   :  { %v363_v46 = vmax.f32 %v358_v44, 0.0 }
 0x1f4   :  { %v360_v47 = vpop.f32.mrf.mxu0 }
 0x1f5   :  { %v364_v48 = vpack.c.bf16 %v363_v46, %v363_v46 }
 0x1f6   :  { %v739_v49 = vpop.f32.mrf.mxu0 }
 0x1f7   :  { %757 = vmatmul.mubr.bf16.vlgmr.msra.gmra.mxu1 %v364_v48 }
 0x2b7   :  { %v470_v53 = vpop.f32.mrf.mxu1 }
 0x2b8   :  { %v471_v54 = vadd.f32 %v657_v52, %v470_v53 }
 0x2b9   :  { %v758_v55 = vpop.f32.mrf.mxu1 }
 0x2ba   :  { %v476_v56 = vmax.f32 %v471_v54, 0.0 }
 0x2bb   :  { %v473_v57 = vpop.f32.mrf.mxu1 }
 0x2bc   :  { %v477_v58 = vpack.c.bf16 %v476_v56, %v476_v56 }
 0x2bd   :  { %v759_v59 = vpop.f32.mrf.mxu1 }
 0x2be   :  { %777 = vmatmul.mubr.bf16.vlgmr.msra.gmra.mxu0 %v477_v58 }
 0x37e   :  { %v583_v2 = vpop.f32.mrf.mxu0 }
 0x37f   :  { %v584_v3 = vadd.f32 %v666_v0, %v583_v2 }
 0x380   :  { %v778_v5 = vpop.f32.mrf.mxu0 }
 0x381   :  { %v589_v6 = vpack.c.bf16 %v584_v3, %v584_v3 }
 0x382   :  { %v586_v7 = vpop.f32.mrf.mxu0 }
 0x383   :  { %v597_v8 = vrot.slane %v589_v6, %v596_v4 }
 0x384   :  { %v779_v9 = vpop.f32.mrf.mxu0 }
 0x385   :  { %v598_v10 = vcombine.high %v597_v8, %v597_v8  ;;  %v605_v11 = vrot.slane %v597_v8, %v596_v4  ;;  %675 = vst.sshfl [vmem:[#allocation14] sm:$0x1 pattern:$0x73625140] %v597_v8 }
 0x387   :  { %v612_v12 = vrot.slane %v598_v10, %v596_v4  ;;  %v613_v13 = vcombine.high %v605_v11, %v605_v11  ;;  %676 = vst.sshfl [vmem:[#allocation14 + $0x1] sm:$0x1 pattern:$0x73625140] %v598_v10 }
 0x389   :  { %v614_v14 = vcombine.high %v612_v12, %v612_v12  ;;  %621 = vst [vmem:[#allocation14 + $0x2] sm:$0x1] %v613_v13 }
 0x38b   :  { %622 = vst [vmem:[#allocation14 + $0x3] sm:$0x1] %v614_v14 }
 0x38c   :  { %627 = vsyncadd [#allocation4], 48  ;;  %s1007_s8 = smov [#allocation14]  }
 0x38d   :  { %s628_s10 = sshll.u32 %s1007_s8, 4  ;;  %s629_s10 = int_to_ptr.vmem [resolvable:$true] %s628_s10 }
 0x38e   :  { %s963_s18 = scalar_lea.vmem %s629_s10, 16  ;;  %s967_s19 = scalar_lea.vmem %s629_s10, 64 }
 0x38f   :  { %p964_p7 = scmp.ne.s32.totalorder %s629_s10, %s963_s18  ;;  %p968_p8 = scmp.lt.s32.totalorder %s629_s10, %s629_s10 }
 0x390   :  { %p969_p9 = scmp.lt.s32.totalorder %s967_s19, %s963_s18 }
 0x392   :  { %p970_p10 = por %p969_p9, %p968_p8 }
 0x394   :  { %p971_p11 = pnand %p970_p10, %p964_p7 }
 0x396   :  { %974 = shalt.err (!%p971_p11)
}
 0x397   :  { %s1008_s1 = smov 16   ;;  %s1009_s20 = smov 1  }
 0x398   :  { %634 = dma.vmem_to_hbm [thread:$0]  %s629_s10, 16, %s1170_s11, [#allocation4], %s1008_s1, %s1008_s1, %s1009_s20  }
 0x399   :  { %991 = dma.done.wait [#allocation4], 64  }
 0x39a   :  { %992 = vsyncadd [#allocation4], 4294967232 }
 0x39b   :  { %638 = vsyncpa [#allocation3], 1 }
 0x39c   :  { %639 = vsyncpa [#allocation6], 1 }
 0x39d   :  { %640 = vsyncpa [#allocation9], 1 }
 0x39e   :  { %641 = vsyncpa [#allocation12], 1 }
 0x39f   :  { %642 = vsyncpa [#allocation4], 1 }

// kernel: tpu_custom_call.1
= control target key start
LH: loop header
LB: loop body
LE: loop exit
PB: predicated region body
PF: predicated region fallthrough
CT: control target
= control target key end

     0   :  { %16 = vsyncpa [#allocation3], 0  ;;  %s1159_s0 = inlined_call_operand.hbm [shape: f32[2,16], index: 0, kind: input, shape index: {}]   ;;  %s1160_s1 = inlined_call_operand.hbm [shape: f32[2,16], index: 1, kind: input, shape index: {}]   ;;  %s1161_s2 = inlined_call_operand.hbm [shape: bf16[16,128], index: 2, kind: input, shape index: {}]   ;;  %s1162_s3 = inlined_call_operand.hbm [shape: bf16[16,128], index: 3, kind: input, shape index: {}]   ;;  %s1163_s4 = inlined_call_operand.vmem [shape: f32[1,128], index: 4, kind: input, shape index: {}]   ;;  %s1164_s5 = inlined_call_operand.hbm [shape: bf16[128,128], index: 5, kind: input, shape index: {}]   ;;  %s1165_s6 = inlined_call_operand.vmem [shape: f32[1,128], index: 6, kind: input, shape index: {}]   ;;  %s1166_s7 = inlined_call_operand.hbm [shape: bf16[128,128], index: 7, kind: input, shape index: {}]   ;;  %s1167_s8 = inlined_call_operand.vmem [shape: f32[1,128], index: 8, kind: input, shape index: {}]   ;;  %s1168_s9 = inlined_call_operand.hbm [shape: bf16[128,128], index: 9, kind: input, shape index: {}]   ;;  %s1169_s10 = inlined_call_operand.vmem [shape: f32[1,128], index: 10, kind: input, shape index: {}]   ;;  %s1170_s11 = inlined_call_operand.hbm [shape: bf16[2,128], index: 11, kind: output, shape index: {}]  }
   0x1   :  { %17 = vsyncpa [#allocation6], 0 }
   0x2   :  { %18 = vsyncpa [#allocation9], 0 }
   0x3   :  { %19 = vsyncpa [#allocation12], 0 }
   0x4   :  { %20 = vsyncpa [#allocation4], 0 }
   0x5   :  { %25 = vsyncadd [#allocation3], 96  ;;  %s993_s17 = smov [#allocation2]  }
   0x6   :  { %s26_s18 = sshll.u32 %s993_s17, 4  ;;  %s27_s18 = int_to_ptr.vmem [resolvable:$true] %s26_s18 }
   0x7   :  { %s831_s19 = scalar_lea.vmem %s27_s18, 32  ;;  %s835_s20 = scalar_lea.vmem %s27_s18, 128 }
   0x8   :  { %p832_p0 = scmp.ne.s32.totalorder %s27_s18, %s831_s19  ;;  %p836_p1 = scmp.lt.s32.totalorder %s27_s18, %s27_s18 }
   0x9   :  { %p837_p2 = scmp.lt.s32.totalorder %s835_s20, %s831_s19 }
   0xb   :  { %p838_p3 = por %p837_p2, %p836_p1 }
   0xd   :  { %p839_p4 = pnand %p838_p3, %p832_p0 }
   0xf   :  { %842 = shalt.err (!%p839_p4)
}
  0x10   :  { %s994_s21 = smov 32   ;;  %s995_s22 = smov 2  }
  0x11   :  { %32 = dma.hbm_to_vmem [thread:$0]  %s1159_s0, 32, %s27_s18, [#allocation3], %s994_s21, %s994_s21, %s995_s22  }
  0x12   :  { %37 = vsyncadd [#allocation6], 96  ;;  %s996_s25 = smov [#allocation5]  }
  0x13   :  { %s38_s26 = sshll.u32 %s996_s25, 4  ;;  %s39_s26 = int_to_ptr.vmem [resolvable:$true] %s38_s26 }
  0x14   :  { %s851_s27 = scalar_lea.vmem %s39_s26, 32  ;;  %s855_s28 = scalar_lea.vmem %s39_s26, 128 }
  0x15   :  { %p852_p5 = scmp.ne.s32.totalorder %s39_s26, %s851_s27  ;;  %p856_p6 = scmp.lt.s32.totalorder %s39_s26, %s39_s26 }
  0x16   :  { %p857_p7 = scmp.lt.s32.totalorder %s855_s28, %s851_s27 }
  0x18   :  { %p858_p8 = por %p857_p7, %p856_p6 }
  0x1a   :  { %p859_p9 = pnand %p858_p8, %p852_p5 }
  0x1c   :  { %862 = shalt.err (!%p859_p9)
}
  0x1d   :  { %44 = dma.hbm_to_vmem [thread:$0]  %s1160_s1, 32, %s39_s26, [#allocation6], %s994_s21, %s994_s21, %s995_s22  }
  0x1e   :  { %s997_s12 = smov [#allocation8]   ;;  %s998_s0 = smov [#allocation11]  }
  0x1f   :  { %s62_s13 = sshll.u32 %s997_s12, 4  ;;  %s90_s14 = sshll.u32 %s998_s0, 4  ;;  %s63_s13 = int_to_ptr.vmem [resolvable:$true] %s62_s13  ;;  %s91_s14 = int_to_ptr.vmem [resolvable:$true] %s90_s14 }
  0x20   :  { %s871_s15 = scalar_lea.vmem %s63_s13, 128  ;;  %p876_p11 = scmp.lt.s32.totalorder %s63_s13, %s63_s13 }
  0x21   :  { %p872_p10 = scmp.ne.s32.totalorder %s63_s13, %s871_s15  ;;  %p877_p12 = scmp.lt.s32.totalorder %s871_s15, %s871_s15 }
  0x23   :  { %p878_p13 = por %p877_p12, %p876_p11 }
  0x25   :  { %p879_p0 = pnand %p878_p13, %p872_p10 }
  0x27   :  { %882 = shalt.err (!%p879_p0)
}
  0x28   :  { %s999_s16 = smov 64   ;;  %s1000_s17 = smov 4  }
  0x29   :  { %68 = dma.hbm_to_vmem [thread:$0]  %s1162_s3, 128, %s63_s13, [#allocation9], %s999_s16, %s999_s16, %s1000_s17  }
  0x2a   :  { %s891_s1 = scalar_lea.vmem %s91_s14, 1024  ;;  %p896_p2 = scmp.lt.s32.totalorder %s91_s14, %s91_s14 }
  0x2b   :  { %p892_p1 = scmp.ne.s32.totalorder %s91_s14, %s891_s1  ;;  %p897_p3 = scmp.lt.s32.totalorder %s891_s1, %s891_s1 }
  0x2d   :  { %p898_p4 = por %p897_p3, %p896_p2 }
  0x2f   :  { %p899_p5 = pnand %p898_p4, %p892_p1 }
  0x31   :  { %902 = shalt.err (!%p899_p5)
}
  0x32   :  { %96 = dma.hbm_to_vmem [thread:$0]  %s1166_s7, 1024, %s91_s14, [#allocation12], %s999_s16, %s999_s16, %s1000_s17  }
  0x33   :  { %s1001_s22 = smov [#allocation7]   ;;  %s1002_s24 = smov [#allocation10]  }
  0x34   :  { %s50_s23 = sshll.u32 %s1001_s22, 4  ;;  %s76_s3 = sshll.u32 %s1002_s24, 4  ;;  %s51_s23 = int_to_ptr.vmem [resolvable:$true] %s50_s23  ;;  %s77_s3 = int_to_ptr.vmem [resolvable:$true] %s76_s3 }
  0x35   :  { %s911_s25 = scalar_lea.vmem %s51_s23, 128  ;;  %p916_p7 = scmp.lt.s32.totalorder %s51_s23, %s51_s23 }
  0x36   :  { %p912_p6 = scmp.ne.s32.totalorder %s51_s23, %s911_s25  ;;  %p917_p8 = scmp.lt.s32.totalorder %s911_s25, %s911_s25 }
  0x38   :  { %p918_p9 = por %p917_p8, %p916_p7 }
  0x3a   :  { %p919_p10 = pnand %p918_p9, %p912_p6 }
  0x3c   :  { %922 = shalt.err (!%p919_p10)
}
  0x3d   :  { %56 = dma.hbm_to_vmem [thread:$0]  %s1161_s2, 128, %s51_s23, [#allocation6], %s999_s16, %s999_s16, %s1000_s17  }
  0x3e   :  { %s931_s7 = scalar_lea.vmem %s77_s3, 1024  ;;  %p936_p12 = scmp.lt.s32.totalorder %s77_s3, %s77_s3 }
  0x3f   :  { %p932_p11 = scmp.ne.s32.totalorder %s77_s3, %s931_s7  ;;  %p937_p13 = scmp.lt.s32.totalorder %s931_s7, %s931_s7 }
  0x41   :  { %p938_p0 = por %p937_p13, %p936_p12 }
  0x43   :  { %p939_p1 = pnand %p938_p0, %p932_p11 }
  0x45   :  { %942 = shalt.err (!%p939_p1)
}
  0x46   :  { %82 = dma.hbm_to_vmem [thread:$0]  %s1164_s5, 1024, %s77_s3, [#allocation9], %s999_s16, %s999_s16, %s1000_s17  }
  0x47   :  { %s1003_s30 = smov [#allocation13]  }
  0x48   :  { %s104_s12 = sshll.u32 %s1003_s30, 4  ;;  %s105_s12 = int_to_ptr.vmem [resolvable:$true] %s104_s12 }
  0x49   :  { %s951_s13 = scalar_lea.vmem %s105_s12, 1024  ;;  %p956_p3 = scmp.lt.s32.totalorder %s105_s12, %s105_s12 }
  0x4a   :  { %p952_p2 = scmp.ne.s32.totalorder %s105_s12, %s951_s13  ;;  %p957_p4 = scmp.lt.s32.totalorder %s951_s13, %s951_s13 }
  0x4c   :  { %p958_p5 = por %p957_p4, %p956_p3 }
  0x4e   :  { %p959_p6 = pnand %p958_p5, %p952_p2 }
  0x50   :  { %962 = shalt.err (!%p959_p6)
}
  0x51   :  { %110 = dma.hbm_to_vmem [thread:$0]  %s1168_s9, 1024, %s105_s12, [#allocation12], %s999_s16, %s999_s16, %s1000_s17  }
  0x52   :  { %983 = dma.done.wait [#allocation3], 128  }
  0x53   :  { %984 = vsyncadd [#allocation3], 4294967168 }
  0x54   :  { %985 = dma.done.wait [#allocation6], 256  }
  0x55   :  { %986 = vsyncadd [#allocation6], 4294967040 }
  0x56   :  { %987 = dma.done.wait [#allocation9], 1152  }
  0x57   :  { %988 = vsyncadd [#allocation9], 4294966144 }
  0x58   :  { %989 = dma.done.wait [#allocation12], 2048  }
  0x59   :  { %990 = vsyncadd [#allocation12], 4294965248  ;;  %v1004_v0 = vmov 0.0   ;;  %vm1005_vm0 = vmmov 0   ;;  %v797_v1 = vld [vmem:[#allocation8] sm:$0xff]   ;;  %v139_v2 = vld [vmem:[#allocation5] sm:$0xff]  ;;  %v594_v62 = vlaneseq }
  0x5a   :  { %708 = vmatprep.subr.bf16.mxu1 %v1004_v0  ;;  %710 = vmatprep.mubr.msk.bf16.mxu1 %vm1005_vm0, %v1004_v0  ;;  %v140_v3 = vpack.c.bf16 %v139_v2, %v139_v2  ;;  %vm149_vm1 = vcmask 130048   ;;  %v798_v4 = vld [vmem:[#allocation7] sm:$0xff]   ;;  %v799_v5 = vld [vmem:[#allocation10 + $0x38] sm:$0xff]   ;;  %v135_v7 = vld [vmem:[#allocation2] sm:$0xff]  ;;  %v1006_v60 = vmov 1966171168  }
  0x5b   :  { %720 = vmatprep.subr.bf16.mxu0 %v1004_v0  ;;  %736 = vmatprep.mubr.msk.bf16.mxu0 %vm1005_vm0, %v1004_v0  ;;  %v800_v6 = vld [vmem:[#allocation10 + $0x30] sm:$0xff]   ;;  %v801_v8 = vld [vmem:[#allocation10 + $0x28] sm:$0xff]   ;;  %v136_v9 = vpack.c.bf16 %v135_v7, %v135_v7  ;;  %v802_v10 = vld [vmem:[#allocation10 + $0x20] sm:$0xff]   ;;  %v592_v61 = vunpack.c.l.s4 %v1006_v60 }
  0x5c   :  { %709 = vmatpush3.bf16.msra.mxu1 %v797_v1  ;;  %721 = vmatpush3.bf16.msra.mxu0 %v799_v5  ;;  %v803_v11 = vld [vmem:[#allocation10 + $0x18] sm:$0xff]   ;;  %v804_v12 = vld [vmem:[#allocation10 + $0x10] sm:$0xff]   ;;  %v805_v13 = vld [vmem:[#allocation10 + $0x8] sm:$0xff]   ;;  %v595_v1 = vshrl.u32 %v594_v62, 7 }
  0x5d   :  { %714 = vmatprep.subr.bf16.mxu1 %v1004_v0  ;;  %722 = vmatprep.subr.bf16.mxu0 %v1004_v0  ;;  %v806_v14 = vld [vmem:[#allocation10] sm:$0xff]   ;;  %v807_v15 = vld [vmem:[#allocation11 + $0x38] sm:$0xff]   ;;  %v808_v16 = vld [vmem:[#allocation11 + $0x30] sm:$0xff]   ;;  %v593_v63 = vunpack.c.0.s8 %v592_v61 }
  0x5e   :  { %v809_v17 = vld [vmem:[#allocation11 + $0x28] sm:$0xff]   ;;  %v810_v18 = vld [vmem:[#allocation11 + $0x20] sm:$0xff]   ;;  %v811_v19 = vld [vmem:[#allocation11 + $0x18] sm:$0xff]  }
  0x5f   :  { %711 = vmatmul.mubr.msk.bf16.vlgmr.msra.gmra.mxu1 %vm149_vm1, %v140_v3  ;;  %v812_v20 = vld [vmem:[#allocation11 + $0x10] sm:$0xff]   ;;  %v647_v26 = vld [vmem:[%s1163_s4] ss:$0 sm:$0xff]  ;;  %v813_v34 = vld [vmem:[#allocation11 + $0x8] sm:$0xff]  }
  0x60   :  { %715 = vmatpush3.bf16.msra.mxu1 %v798_v4  ;;  %716 = vmatprep.mubr.msk.bf16.mxu1 %vm1005_vm0, %v1004_v0  ;;  %v814_v35 = vld [vmem:[#allocation11] sm:$0xff]   ;;  %v815_v36 = vld [vmem:[#allocation13 + $0x38] sm:$0xff]   ;;  %v816_v37 = vld [vmem:[#allocation13 + $0x30] sm:$0xff]   ;;  %v596_v4 = vsub.s32 %v593_v63, %v595_v1 }
  0x61   :  { %740 = vmatprep.subr.bf16.mxu1 %v1004_v0  ;;  %723 = vmatpush3.bf16.msra.mxu0 %v800_v6  ;;  %v817_v38 = vld [vmem:[#allocation13 + $0x28] sm:$0xff]   ;;  %v818_v39 = vld [vmem:[#allocation13 + $0x20] sm:$0xff]   ;;  %v819_v40 = vld [vmem:[#allocation13 + $0x18] sm:$0xff]  }
  0x62   :  { %724 = vmatprep.subr.bf16.mxu0 %v1004_v0  ;;  %v820_v41 = vld [vmem:[#allocation13 + $0x10] sm:$0xff]   ;;  %v648_v42 = vld [vmem:[%s1165_s6] ss:$0 sm:$0xff]  ;;  %v821_v50 = vld [vmem:[#allocation13 + $0x8] sm:$0xff]  }
  0x63   :  { %v822_v51 = vld [vmem:[#allocation13] sm:$0xff]  }
  0x64   :  { %v657_v52 = vld [vmem:[%s1167_s8] ss:$0 sm:$0xff] }
  0x65   :  { %725 = vmatpush3.bf16.msra.mxu0 %v801_v8 }
  0x66   :  { %726 = vmatprep.subr.bf16.mxu0 %v1004_v0 }
  0x67   :  { %717 = vmatmul.mubr.msk.bf16.vlgmr.msra.gmra.mxu1 %vm149_vm1, %v136_v9 }
  0x68   :  { %756 = vmatprep.mubr.msk.bf16.mxu1 %vm1005_vm0, %v1004_v0  ;;  %741 = vmatpush3.bf16.msra.mxu1 %v807_v15 }
  0x69   :  { %727 = vmatpush3.bf16.msra.mxu0 %v802_v10  ;;  %742 = vmatprep.subr.bf16.mxu1 %v1004_v0 }
  0x6a   :  { %728 = vmatprep.subr.bf16.mxu0 %v1004_v0 }
  0x6c   :  { %743 = vmatpush3.bf16.msra.mxu1 %v808_v16 }
  0x6d   :  { %729 = vmatpush3.bf16.msra.mxu0 %v803_v11  ;;  %744 = vmatprep.subr.bf16.mxu1 %v1004_v0 }
  0x6e   :  { %730 = vmatprep.subr.bf16.mxu0 %v1004_v0 }
  0x70   :  { %745 = vmatpush3.bf16.msra.mxu1 %v809_v17 }
  0x71   :  { %731 = vmatpush3.bf16.msra.mxu0 %v804_v12  ;;  %746 = vmatprep.subr.bf16.mxu1 %v1004_v0 }
  0x72   :  { %732 = vmatprep.subr.bf16.mxu0 %v1004_v0 }
  0x74   :  { %747 = vmatpush3.bf16.msra.mxu1 %v810_v18 }
  0x75   :  { %733 = vmatpush3.bf16.msra.mxu0 %v805_v13  ;;  %748 = vmatprep.subr.bf16.mxu1 %v1004_v0 }
  0x76   :  { %734 = vmatprep.subr.bf16.mxu0 %v1004_v0 }
  0x78   :  { %749 = vmatpush3.bf16.msra.mxu1 %v811_v19 }
  0x79   :  { %735 = vmatpush3.bf16.msra.mxu0 %v806_v14  ;;  %750 = vmatprep.subr.bf16.mxu1 %v1004_v0 }
  0x7a   :  { %760 = vmatprep.subr.bf16.mxu0 %v1004_v0 }
  0x7c   :  { %751 = vmatpush3.bf16.msra.mxu1 %v812_v20 }
  0x7d   :  { %752 = vmatprep.subr.bf16.mxu1 %v1004_v0 }
  0x80   :  { %753 = vmatpush3.bf16.msra.mxu1 %v813_v34 }
  0x81   :  { %754 = vmatprep.subr.bf16.mxu1 %v1004_v0 }
  0x84   :  { %755 = vmatpush3.bf16.msra.mxu1 %v814_v35 }
 0x11f   :  { %v187_v21 = vpop.f32.mrf.mxu1 }
 0x121   :  { %v712_v22 = vpop.f32.mrf.mxu1 }
 0x123   :  { %v190_v23 = vpop.f32.mrf.mxu1 }
 0x125   :  { %v713_v24 = vpop.f32.mrf.mxu1 }
 0x127   :  { %v236_v25 = vpop.f32.mrf.mxu1 }
 0x128   :  { %v237_v27 = vadd.f32 %v236_v25, %v187_v21 }
 0x129   :  { %v718_v28 = vpop.f32.mrf.mxu1 }
 0x12a   :  { %v249_v29 = vadd.f32 %v647_v26, %v237_v27 }
 0x12b   :  { %v239_v30 = vpop.f32.mrf.mxu1 }
 0x12c   :  { %v250_v31 = vmax.f32 %v249_v29, 0.0 }
 0x12d   :  { %v719_v32 = vpop.f32.mrf.mxu1 }
 0x12e   :  { %v251_v33 = vpack.c.bf16 %v250_v31, %v250_v31 }
 0x130   :  { %737 = vmatmul.mubr.bf16.vlgmr.msra.gmra.mxu0 %v251_v33 }
 0x131   :  { %776 = vmatprep.mubr.msk.bf16.mxu0 %vm1005_vm0, %v1004_v0  ;;  %761 = vmatpush3.bf16.msra.mxu0 %v815_v36 }
 0x132   :  { %762 = vmatprep.subr.bf16.mxu0 %v1004_v0 }
 0x135   :  { %763 = vmatpush3.bf16.msra.mxu0 %v816_v37 }
 0x136   :  { %764 = vmatprep.subr.bf16.mxu0 %v1004_v0 }
 0x139   :  { %765 = vmatpush3.bf16.msra.mxu0 %v817_v38 }
 0x13a   :  { %766 = vmatprep.subr.bf16.mxu0 %v1004_v0 }
 0x13d   :  { %767 = vmatpush3.bf16.msra.mxu0 %v818_v39 }
 0x13e   :  { %768 = vmatprep.subr.bf16.mxu0 %v1004_v0 }
 0x141   :  { %769 = vmatpush3.bf16.msra.mxu0 %v819_v40 }
 0x142   :  { %770 = vmatprep.subr.bf16.mxu0 %v1004_v0 }
 0x145   :  { %771 = vmatpush3.bf16.msra.mxu0 %v820_v41 }
 0x146   :  { %772 = vmatprep.subr.bf16.mxu0 %v1004_v0 }
 0x149   :  { %773 = vmatpush3.bf16.msra.mxu0 %v821_v50 }
 0x14a   :  { %774 = vmatprep.subr.bf16.mxu0 %v1004_v0  ;;  %v666_v0 = vld [vmem:[%s1169_s10] ss:$0 sm:$0xff] }
 0x14d   :  { %775 = vmatpush3.bf16.msra.mxu0 %v822_v51 }
 0x1f0   :  { %v357_v43 = vpop.f32.mrf.mxu0 }
 0x1f1   :  { %v358_v44 = vadd.f32 %v648_v42, %v357_v43 }
 0x1f2   :  { %v738_v45 = vpop.f32.mrf.mxu0 }
 0x1f3   :  { %v363_v46 = vmax.f32 %v358_v44, 0.0 }
 0x1f4   :  { %v360_v47 = vpop.f32.mrf.mxu0 }
 0x1f5   :  { %v364_v48 = vpack.c.bf16 %v363_v46, %v363_v46 }
 0x1f6   :  { %v739_v49 = vpop.f32.mrf.mxu0 }
 0x1f7   :  { %757 = vmatmul.mubr.bf16.vlgmr.msra.gmra.mxu1 %v364_v48 }
 0x2b7   :  { %v470_v53 = vpop.f32.mrf.mxu1 }
 0x2b8   :  { %v471_v54 = vadd.f32 %v657_v52, %v470_v53 }
 0x2b9   :  { %v758_v55 = vpop.f32.mrf.mxu1 }
 0x2ba   :  { %v476_v56 = vmax.f32 %v471_v54, 0.0 }
 0x2bb   :  { %v473_v57 = vpop.f32.mrf.mxu1 }
 0x2bc   :  { %v477_v58 = vpack.c.bf16 %v476_v56, %v476_v56 }
 0x2bd   :  { %v759_v59 = vpop.f32.mrf.mxu1 }
 0x2be   :  { %777 = vmatmul.mubr.bf16.vlgmr.msra.gmra.mxu0 %v477_v58 }
 0x37e   :  { %v583_v2 = vpop.f32.mrf.mxu0 }
 0x37f   :  { %v584_v3 = vadd.f32 %v666_v0, %v583_v2 }
 0x380   :  { %v778_v5 = vpop.f32.mrf.mxu0 }
 0x381   :  { %v589_v6 = vpack.c.bf16 %v584_v3, %v584_v3 }
 0x382   :  { %v586_v7 = vpop.f32.mrf.mxu0 }
 0x383   :  { %v597_v8 = vrot.slane %v589_v6, %v596_v4 }
 0x384   :  { %v779_v9 = vpop.f32.mrf.mxu0 }
 0x385   :  { %v598_v10 = vcombine.high %v597_v8, %v597_v8  ;;  %v605_v11 = vrot.slane %v597_v8, %v596_v4  ;;  %675 = vst.sshfl [vmem:[#allocation14] sm:$0x1 pattern:$0x73625140] %v597_v8 }
 0x387   :  { %v612_v12 = vrot.slane %v598_v10, %v596_v4  ;;  %v613_v13 = vcombine.high %v605_v11, %v605_v11  ;;  %676 = vst.sshfl [vmem:[#allocation14 + $0x1] sm:$0x1 pattern:$0x73625140] %v598_v10 }
 0x389   :  { %v614_v14 = vcombine.high %v612_v12, %v612_v12  ;;  %621 = vst [vmem:[#allocation14 + $0x2] sm:$0x1] %v613_v13 }
 0x38b   :  { %622 = vst [vmem:[#allocation14 + $0x3] sm:$0x1] %v614_v14 }
 0x38c   :  { %627 = vsyncadd [#allocation4], 48  ;;  %s1007_s8 = smov [#allocation14]  }
 0x38d   :  { %s628_s10 = sshll.u32 %s1007_s8, 4  ;;  %s629_s10 = int_to_ptr.vmem [resolvable:$true] %s628_s10 }
 0x38e   :  { %s963_s18 = scalar_lea.vmem %s629_s10, 16  ;;  %s967_s19 = scalar_lea.vmem %s629_s10, 64 }
 0x38f   :  { %p964_p7 = scmp.ne.s32.totalorder %s629_s10, %s963_s18  ;;  %p968_p8 = scmp.lt.s32.totalorder %s629_s10, %s629_s10 }
 0x390   :  { %p969_p9 = scmp.lt.s32.totalorder %s967_s19, %s963_s18 }
 0x392   :  { %p970_p10 = por %p969_p9, %p968_p8 }
 0x394   :  { %p971_p11 = pnand %p970_p10, %p964_p7 }
 0x396   :  { %974 = shalt.err (!%p971_p11)
}
 0x397   :  { %s1008_s1 = smov 16   ;;  %s1009_s20 = smov 1  }
 0x398   :  { %634 = dma.vmem_to_hbm [thread:$0]  %s629_s10, 16, %s1170_s11, [#allocation4], %s1008_s1, %s1008_s1, %s1009_s20  }
 0x399   :  { %991 = dma.done.wait [#allocation4], 64  }
 0x39a   :  { %992 = vsyncadd [#allocation4], 4294967232 }
 0x39b   :  { %638 = vsyncpa [#allocation3], 1 }
 0x39c   :  { %639 = vsyncpa [#allocation6], 1 }
 0x39d   :  { %640 = vsyncpa [#allocation9], 1 }
 0x39e   :  { %641 = vsyncpa [#allocation12], 1 }
 0x39f   :  { %642 = vsyncpa [#allocation4], 1 }

</bundles_post_ra>
